<compile_context>
chip_gen: v7x
topology: tpu7x:2x2x1
jax: 0.10.0
libtpu: 0.0.40
codegen_flags: <defaults>
</compile_context>

<pallas_src>
import math

import jax
import jax.numpy as jnp
from jax import lax
from jax.experimental import pallas as pl
from jax.experimental.pallas import tpu as pltpu


def _round_up(x, m):
    return (x + m - 1) // m * m


# ---------------------------------------------------------------------------
# Kernels: multi-K-step (accumulator) variants
# ---------------------------------------------------------------------------
def _linear_bias_kernel(x_ref, w_ref, b_ref, o_ref, acc_ref):
    # x_ref: (tm, tk)  w_ref: (tn, tk)  b_ref: (1, tn)  o_ref: (tm, tn)
    # acc_ref: (tm, tn) f32 scratch, accumulated across the K grid axis.
    @pl.when(pl.program_id(2) == 0)
    def _():
        acc_ref[...] = jnp.zeros_like(acc_ref)

    acc_ref[...] += lax.dot_general(
        x_ref[...],
        w_ref[...],
        dimension_numbers=(((1,), (1,)), ((), ())),  # contract last axes: x@W.T
        preferred_element_type=jnp.float32,
    )

    @pl.when(pl.program_id(2) == pl.num_programs(2) - 1)
    def _():
        o_ref[...] = (acc_ref[...] + b_ref[...]).astype(o_ref.dtype)


def _linear_nobias_kernel(x_ref, w_ref, o_ref, acc_ref):
    @pl.when(pl.program_id(2) == 0)
    def _():
        acc_ref[...] = jnp.zeros_like(acc_ref)

    acc_ref[...] += lax.dot_general(
        x_ref[...],
        w_ref[...],
        dimension_numbers=(((1,), (1,)), ((), ())),
        preferred_element_type=jnp.float32,
    )

    @pl.when(pl.program_id(2) == pl.num_programs(2) - 1)
    def _():
        o_ref[...] = acc_ref[...].astype(o_ref.dtype)


# ---------------------------------------------------------------------------
# Kernels: single-K-step fast path (no scratch, 2-D grid, fully parallel)
# ---------------------------------------------------------------------------
def _linear_bias_kernel_k1(x_ref, w_ref, b_ref, o_ref):
    acc = lax.dot_general(
        x_ref[...],
        w_ref[...],
        dimension_numbers=(((1,), (1,)), ((), ())),
        preferred_element_type=jnp.float32,
    )
    o_ref[...] = (acc + b_ref[...]).astype(o_ref.dtype)


def _linear_nobias_kernel_k1(x_ref, w_ref, o_ref):
    acc = lax.dot_general(
        x_ref[...],
        w_ref[...],
        dimension_numbers=(((1,), (1,)), ((), ())),
        preferred_element_type=jnp.float32,
    )
    o_ref[...] = acc.astype(o_ref.dtype)


def lazy_linear_forward(x, weight, bias=None, *, tm=None, tn=None, tk=None):
    """y = x @ weight.T + bias, matching torch.nn.functional.linear.

    x:      (..., in_features)
    weight: (out_features, in_features)   -- PyTorch layout, NOT transposed
    bias:   (out_features,) or None
    """
    K = x.shape[-1]
    N, Kw = weight.shape
    assert K == Kw, "in_features mismatch between input and weight"
    lead_shape = x.shape[:-1]
    M = int(math.prod(lead_shape)) if lead_shape else 1
    out_dtype = jnp.result_type(x.dtype, weight.dtype)

    # --- tile selection (MXU-shaped, lane-dense, VMEM-safe on v5e/v6e/v7x) ---
    itemsize = jnp.dtype(x.dtype).itemsize
    sub = {4: 8, 2: 16, 1: 32}.get(itemsize, 8)  # min sublane multiple per dtype
    if tm is None:
        tm = min(512, _round_up(M, sub))
    if tn is None:
        tn = min(512, _round_up(N, 128))
    if tk is None:
        tk = min(1024, _round_up(K, 128))

    Mp = _round_up(M, tm)
    Np = _round_up(N, tn)
    Kp = _round_up(K, tk)

    # --- wrapper-side zero padding to aligned shapes (zeros are inert in dot) ---
    x2d = x.reshape(M, K)
    if (Mp, Kp) != (M, K):
        x2d = jnp.pad(x2d, ((0, Mp - M), (0, Kp - K)))
    w2d = weight
    if (Np, Kp) != (N, K):
        w2d = jnp.pad(weight, ((0, Np - N), (0, Kp - K)))

    single_k = Kp == tk

    # Double-buffered inputs/output + f32 accumulator; give the compiler
    # explicit headroom (well under the 16/32 MiB scoped defaults and 64 MiB
    # v7x physical VMEM for these tile sizes).
    blk_bytes = (
        2 * itemsize * (tm * tk + tn * tk)
        + 2 * jnp.dtype(out_dtype).itemsize * tm * tn
        + 4 * tm * tn
    )
    vmem_limit = int(min(64 * 1024 * 1024, max(2 * blk_bytes, 16 * 1024 * 1024)))

    cost = pl.CostEstimate(
        flops=2 * Mp * Kp * Np,
        transcendentals=0,
        bytes_accessed=itemsize * (Mp * Kp + Np * Kp + Mp * Np),
    )

    if bias is not None:
        b2d = bias.reshape(1, N).astype(jnp.float32)
        if Np != N:
            b2d = jnp.pad(b2d, ((0, 0), (0, Np - N)))

    if single_k:
        # ---- 2-D grid, no accumulator scratch, fully parallel ----
        grid = (Mp // tm, Np // tn)
        x_spec = pl.BlockSpec((tm, tk), lambda i, j: (i, 0))
        w_spec = pl.BlockSpec((tn, tk), lambda i, j: (j, 0))
        o_spec = pl.BlockSpec((tm, tn), lambda i, j: (i, j))
        compiler_params = pltpu.CompilerParams(
            dimension_semantics=("parallel", "parallel"),
            vmem_limit_bytes=vmem_limit,
        )
        if bias is not None:
            kernel = _linear_bias_kernel_k1
            in_specs = [x_spec, w_spec, pl.BlockSpec((1, tn), lambda i, j: (0, j))]
            args = (x2d, w2d, b2d)
        else:
            kernel = _linear_nobias_kernel_k1
            in_specs = [x_spec, w_spec]
            args = (x2d, w2d)
        scratch_shapes = []
    else:
        # ---- 3-D grid with f32 accumulator across the K ("arbitrary") axis ----
        grid = (Mp // tm, Np // tn, Kp // tk)
        x_spec = pl.BlockSpec((tm, tk), lambda i, j, k: (i, k))
        w_spec = pl.BlockSpec((tn, tk), lambda i, j, k: (j, k))
        o_spec = pl.BlockSpec((tm, tn), lambda i, j, k: (i, j))
        compiler_params = pltpu.CompilerParams(
            dimension_semantics=("parallel", "parallel", "arbitrary"),
            vmem_limit_bytes=vmem_limit,
        )
        if bias is not None:
            kernel = _linear_bias_kernel
            in_specs = [x_spec, w_spec, pl.BlockSpec((1, tn), lambda i, j, k: (0, j))]
            args = (x2d, w2d, b2d)
        else:
            kernel = _linear_nobias_kernel
            in_specs = [x_spec, w_spec]
            args = (x2d, w2d)
        scratch_shapes = [pltpu.VMEM((tm, tn), jnp.float32)]

    y2d = pl.pallas_call(
        kernel,
        out_shape=jax.ShapeDtypeStruct((Mp, Np), out_dtype),
        grid_spec=pltpu.PrefetchScalarGridSpec(
            num_scalar_prefetch=0,
            grid=grid,
            in_specs=in_specs,
            out_specs=o_spec,
            scratch_shapes=scratch_shapes,
        ),
        compiler_params=compiler_params,
        cost_estimate=cost,
    )(*args)

    y2d = y2d[:M, :N]
    return y2d.reshape(*lead_shape, N)


def init_lazy_linear_params(key, in_features, out_features, bias=True):
    """Deterministic init matching LazyLinear.reset_parameters():
    kaiming_uniform_(a=sqrt(5)) -> U(-1/sqrt(fan_in), 1/sqrt(fan_in)) for weight,
    bias ~ U(-1/sqrt(fan_in), 1/sqrt(fan_in)).
    """
    k_w, k_b = jax.random.split(key)
    bound = 1.0 / math.sqrt(in_features)
    weight = jax.random.uniform(
        k_w, (out_features, in_features), jnp.float32, -bound, bound
    )
    b = (
        jax.random.uniform(k_b, (out_features,), jnp.float32, -bound, bound)
        if bias
        else None
    )
    return weight, b


if __name__ == "__main__":
    key = jax.random.PRNGKey(0)
    k_x, k_p, k_x2, k_p2 = jax.random.split(key, 4)

    # Test 1: shapes implied by the module's forward ("lazy" in_features
    # inferred from the input's last dim at first forward), with bias.
    # Exercises the single-K-step fast path.
    batch, seq, in_features, out_features = 2, 8, 32, 64
    x = jax.random.normal(k_x, (batch, seq, in_features), jnp.float32)
    weight, bias = init_lazy_linear_params(k_p, in_features, out_features, bias=True)

    y = jax.block_until_ready(lazy_linear_forward(x, weight, bias))
    y_ref = jnp.einsum("bsk,nk->bsn", x, weight) + bias
    assert y.shape == (batch, seq, out_features)
    assert jnp.allclose(y, y_ref, atol=1e-3, rtol=1e-3)

    # Test 2: unaligned M/N, forced K tiling (exercises the f32 accumulator
    # init/finalize path on the 3-D grid), no bias.
    x2 = jax.random.normal(k_x2, (3, 7, 256), jnp.float32)
    w2, _ = init_lazy_linear_params(k_p2, 256, 200, bias=False)
    y2 = jax.block_until_ready(lazy_linear_forward(x2, w2, None, tk=128))
    y2_ref = jnp.einsum("bsk,nk->bsn", x2, w2)
    assert y2.shape == (3, 7, 200)
    assert jnp.allclose(y2, y2_ref, atol=1e-3, rtol=1e-3)

    # Test 3: multi-K path with bias, unaligned everything.
    x3 = jax.random.normal(k_x, (5, 300), jnp.float32)
    w3, b3 = init_lazy_linear_params(k_p, 300, 130, bias=True)
    y3 = jax.block_until_ready(lazy_linear_forward(x3, w3, b3, tk=128))
    y3_ref = x3 @ w3.T + b3
    assert y3.shape == (5, 130)
    assert jnp.allclose(y3, y3_ref, atol=1e-3, rtol=1e-3)

    print("KERNEL_OK")
</pallas_src>

<mosaic_0001>
module attributes {stable_mosaic.version = 11 : i64} {
  func.func @_linear_bias_kernel_k1(%arg0: i32, %arg1: i32, %arg2: memref<16x128xf32, #tpu.memory_space<vmem>>, %arg3: memref<128x128xf32, #tpu.memory_space<vmem>>, %arg4: memref<1x128xf32, #tpu.memory_space<vmem>>, %arg5: memref<16x128xf32, #tpu.memory_space<vmem>>) attributes {dimension_semantics = [#tpu.dimension_semantics<parallel>, #tpu.dimension_semantics<parallel>], iteration_bounds = array<i64: 1, 1>, scalar_prefetch = 0 : i64, scratch_operands = 0 : i64, tpu.core_type = #tpu.core_type<tc>, window_params = [{transform_indices = @transform_0, window_bounds = array<i64: 16, 128>}, {transform_indices = @transform_1, window_bounds = array<i64: 128, 128>}, {transform_indices = @transform_2, window_bounds = array<i64: 1, 128>}, {transform_indices = @transform_3, window_bounds = array<i64: 16, 128>}]} {
    %c0 = arith.constant 0 : index
    %c0_0 = arith.constant 0 : index
    %0 = vector.load %arg2[%c0, %c0_0] : memref<16x128xf32, #tpu.memory_space<vmem>>, vector<16x128xf32>
    %c0_1 = arith.constant 0 : index
    %c0_2 = arith.constant 0 : index
    %1 = vector.load %arg3[%c0_1, %c0_2] : memref<128x128xf32, #tpu.memory_space<vmem>>, vector<128x128xf32>
    %cst = arith.constant dense<0.000000e+00> : vector<16x128xf32>
    %2 = tpu.matmul %0, %1, %cst {dimension_numbers = #tpu.dot_dimension_numbers<[1], [1], [0], [0], [0, 0, 1, 0], [], []>} : vector<16x128xf32>, vector<128x128xf32>, vector<16x128xf32> -> vector<16x128xf32>
    %c0_3 = arith.constant 0 : index
    %c0_4 = arith.constant 0 : index
    %3 = vector.load %arg4[%c0_3, %c0_4] : memref<1x128xf32, #tpu.memory_space<vmem>>, vector<1x128xf32>
    %4 = vector.broadcast %3 : vector<1x128xf32> to vector<16x128xf32>
    %5 = arith.addf %2, %4 : vector<16x128xf32>
    %c0_5 = arith.constant 0 : index
    %c0_6 = arith.constant 0 : index
    %6 = vector.load %arg5[%c0_5, %c0_6] : memref<16x128xf32, #tpu.memory_space<vmem>>, vector<16x128xf32>
    tpu.vector_store %arg5[%c0_5, %c0_6], %5 {strides = array<i32>} : memref<16x128xf32, #tpu.memory_space<vmem>>, vector<16x128xf32>,
    return
  }
  func.func @transform_0(%arg0: i32, %arg1: i32) -> (i32, i32) {
    %c0_i32 = arith.constant 0 : i32
    %c0_i32_0 = arith.constant 0 : i32
    return %arg0, %c0_i32 : i32, i32
  }
  func.func @transform_1(%arg0: i32, %arg1: i32) -> (i32, i32) {
    %c0_i32 = arith.constant 0 : i32
    %c0_i32_0 = arith.constant 0 : i32
    return %arg1, %c0_i32 : i32, i32
  }
  func.func @transform_2(%arg0: i32, %arg1: i32) -> (i32, i32) {
    %c0_i32 = arith.constant 0 : i32
    %c0_i32_0 = arith.constant 0 : i32
    return %c0_i32, %arg1 : i32, i32
  }
  func.func @transform_3(%arg0: i32, %arg1: i32) -> (i32, i32) {
    %c0_i32 = arith.constant 0 : i32
    return %arg0, %arg1 : i32, i32
  }
}

</mosaic_0001>

<bundles_post_ra>
// kernel: tpu_custom_call.1
= control target key start
LH: loop header
LB: loop body
LE: loop exit
PB: predicated region body
PF: predicated region fallthrough
CT: control target
= control target key end

     0   :  { %8 = vsyncpa [#allocation3], 0  ;;  %s399_s0 = inlined_call_operand.hbm [shape: f32[16,128], index: 0, kind: input, shape index: {}]   ;;  %s400_s1 = inlined_call_operand.hbm [shape: f32[128,128], index: 1, kind: input, shape index: {}]   ;;  %s401_s2 = inlined_call_operand.vmem [shape: f32[1,128], index: 2, kind: input, shape index: {}]   ;;  %s402_s3 = inlined_call_operand.hbm [shape: f32[16,128], index: 3, kind: output, shape index: {}]  }
   0x1   :  { %9 = vsyncpa [#allocation6], 0 }
   0x2   :  { %10 = vsyncpa [#allocation4], 0  ;;  %s326_s12 = smov [#allocation2]   ;;  %s254_s16 = scalar_lea.hbm %s399_s0, 256 }
   0x3   :  { %s16_s13 = sshll.u32 %s326_s12, 4  ;;  %p255_p0 = scmp.ne.s32.totalorder %s399_s0, %s254_s16  ;;  %s17_s13 = int_to_ptr.vmem [resolvable:$true] %s16_s13 }
   0x4   :  { %p258_p1 = scmp.lt.u32.totalorder %s254_s16, %s399_s0 }
   0x6   :  { %p260_p2 = pnand %p258_p1, %p255_p0 }
   0x8   :  { %263 = shalt.err (!%p260_p2)
}
   0x9   :  { %s264_s21 = scalar_lea.vmem %s17_s13, 256  ;;  %p269_p4 = scmp.lt.s32.totalorder %s17_s13, %s17_s13 }
   0xa   :  { %p265_p3 = scmp.ne.s32.totalorder %s17_s13, %s264_s21  ;;  %p270_p5 = scmp.lt.s32.totalorder %s264_s21, %s264_s21 }
   0xc   :  { %p271_p6 = por %p270_p5, %p269_p4 }
   0xe   :  { %p272_p7 = pnand %p271_p6, %p265_p3 }
  0x10   :  { %275 = shalt.err (!%p272_p7)
}
  0x11   :  { %s327_s22 = smov 128   ;;  %s328_s23 = smov 8  }
  0x12   :  { %22 = dma.hbm_to_vmem [thread:$0]  %s399_s0, 256, %s17_s13, [#allocation3], %s327_s22, %s327_s22, %s328_s23  }
  0x13   :  { %s329_s26 = smov [#allocation5]   ;;  %s276_s30 = scalar_lea.hbm %s400_s1, 2048 }
  0x14   :  { %s28_s27 = sshll.u32 %s329_s26, 4  ;;  %p277_p8 = scmp.ne.s32.totalorder %s400_s1, %s276_s30  ;;  %s29_s27 = int_to_ptr.vmem [resolvable:$true] %s28_s27 }
  0x15   :  { %p280_p9 = scmp.lt.u32.totalorder %s276_s30, %s400_s1 }
  0x17   :  { %p282_p10 = pnand %p280_p9, %p277_p8 }
  0x19   :  { %285 = shalt.err (!%p282_p10)
}
  0x1a   :  { %s286_s8 = scalar_lea.vmem %s29_s27, 2048  ;;  %p291_p12 = scmp.lt.s32.totalorder %s29_s27, %s29_s27 }
  0x1b   :  { %p287_p11 = scmp.ne.s32.totalorder %s29_s27, %s286_s8  ;;  %p292_p13 = scmp.lt.s32.totalorder %s286_s8, %s286_s8 }
  0x1d   :  { %p293_p0 = por %p292_p13, %p291_p12 }
  0x1f   :  { %p294_p1 = pnand %p293_p0, %p287_p11 }
  0x21   :  { %297 = shalt.err (!%p294_p1)
}
  0x22   :  { %34 = dma.hbm_to_vmem [thread:$0]  %s400_s1, 2048, %s29_s27, [#allocation6], %s327_s22, %s327_s22, %s328_s23  }
  0x23   :  { %320 = dma.done.wait [#allocation3], 256  }
  0x24   :  { %321 = vsyncadd [#allocation3], 4294967040 }
  0x25   :  { %322 = dma.done.wait [#allocation6], 2048  }
  0x26   :  { %323 = vsyncadd [#allocation6], 4294965248  ;;  %v45_v0 = vld [vmem:[#allocation5] sm:$0xff]  ;;  %v46_v1 = vld [vmem:[#allocation5 + $0x8] sm:$0xff]  ;;  %s330_s11 = smov [#allocation7]  }
  0x27   :  { %v47_v2 = vld [vmem:[#allocation5 + $0x10] sm:$0xff]  ;;  %v217_v3 = vpack.c.bf16 %v46_v1, %v45_v0  ;;  %v48_v4 = vld [vmem:[#allocation5 + $0x18] sm:$0xff]  ;;  %v49_v7 = vld [vmem:[#allocation5 + $0x20] sm:$0xff]  ;;  %s150_s12 = sshll.u32 %s330_s11, 4  ;;  %s151_s12 = int_to_ptr.vmem [resolvable:$true] %s150_s12 }
  0x28   :  { %v221_v5 = vpack.c.bf16 %v48_v4, %v47_v2  ;;  %v43_v6 = vld [vmem:[#allocation2] sm:$0xff]  ;;  %v50_v8 = vld [vmem:[#allocation5 + $0x28] sm:$0xff]  ;;  %v52_v11 = vld [vmem:[#allocation5 + $0x38] sm:$0xff]  ;;  %s298_s13 = scalar_lea.vmem %s151_s12, 256  ;;  %p303_p3 = scmp.lt.s32.totalorder %s151_s12, %s151_s12 }
  0x29   :  { %218 = vmatprep.subr.bf16.mxu0 %v217_v3  ;;  %214 = vmatprep.mubr.f32.mxu0 %v43_v6  ;;  %v225_v9 = vpack.c.bf16 %v50_v8, %v49_v7  ;;  %v51_v10 = vld [vmem:[#allocation5 + $0x30] sm:$0xff]  ;;  %v53_v13 = vld [vmem:[#allocation5 + $0x40] sm:$0xff]  ;;  %v54_v14 = vld [vmem:[#allocation5 + $0x48] sm:$0xff]  ;;  %p299_p2 = scmp.ne.s32.totalorder %s151_s12, %s298_s13  ;;  %p304_p4 = scmp.lt.s32.totalorder %s298_s13, %s298_s13 }
  0x2a   :  { %220 = vmatpush3.bf16.xpose.msra.mxu0 %v217_v3  ;;  %v229_v12 = vpack.c.bf16 %v52_v11, %v51_v10  ;;  %v233_v15 = vpack.c.bf16 %v54_v14, %v53_v13  ;;  %v55_v16 = vld [vmem:[#allocation5 + $0x50] sm:$0xff]  ;;  %v56_v17 = vld [vmem:[#allocation5 + $0x58] sm:$0xff]  ;;  %v57_v19 = vld [vmem:[#allocation5 + $0x60] sm:$0xff] }
  0x2b   :  { %222 = vmatprep.subr.bf16.mxu0 %v221_v5  ;;  %v237_v18 = vpack.c.bf16 %v56_v17, %v55_v16  ;;  %v58_v20 = vld [vmem:[#allocation5 + $0x68] sm:$0xff]  ;;  %v59_v22 = vld [vmem:[#allocation5 + $0x70] sm:$0xff]  ;;  %v60_v23 = vld [vmem:[#allocation5 + $0x78] sm:$0xff]  ;;  %p305_p5 = por %p304_p4, %p303_p3 }
  0x2c   :  { %v241_v21 = vpack.c.bf16 %v58_v20, %v57_v19  ;;  %v245_v24 = vpack.c.bf16 %v60_v23, %v59_v22  ;;  %v44_v25 = vld [vmem:[#allocation2 + $0x8] sm:$0xff]  ;;  %v163_v26 = vld [vmem:[%s401_s2] ss:$0 sm:$0xff] }
  0x2d   :  { %p306_p6 = pnand %p305_p5, %p299_p2 }
  0x32   :  { %224 = vmatpush3.bf16.xpose.msra.mxu0 %v221_v5 }
  0x33   :  { %226 = vmatprep.subr.bf16.mxu0 %v225_v9 }
  0x3a   :  { %228 = vmatpush3.bf16.xpose.msra.mxu0 %v225_v9 }
  0x3b   :  { %230 = vmatprep.subr.bf16.mxu0 %v229_v12 }
  0x42   :  { %232 = vmatpush3.bf16.xpose.msra.mxu0 %v229_v12 }
  0x43   :  { %234 = vmatprep.subr.bf16.mxu0 %v233_v15 }
  0x4a   :  { %236 = vmatpush3.bf16.xpose.msra.mxu0 %v233_v15 }
  0x4b   :  { %238 = vmatprep.subr.bf16.mxu0 %v237_v18 }
  0x52   :  { %240 = vmatpush3.bf16.xpose.msra.mxu0 %v237_v18 }
  0x53   :  { %242 = vmatprep.subr.bf16.mxu0 %v241_v21 }
  0x5a   :  { %244 = vmatpush3.bf16.xpose.msra.mxu0 %v241_v21 }
  0x5b   :  { %246 = vmatprep.subr.bf16.mxu0 %v245_v24 }
  0x62   :  { %248 = vmatpush3.bf16.xpose.msra.mxu0 %v245_v24 }
  0x69   :  { %215 = vmatmul.mubr.f32.vlgmr.msra.gmra.mrb[0].mxu0 %v44_v25 }
 0x13c   :  { %v216_v27 = vpop.f32.mrb[0].mxu0 }
 0x13d   :  { %v140_v28 = vadd.f32 %v216_v27, %v163_v26  ;;  %v134_v29 = vpop.f32.mrb[1].mxu0 }
 0x13e   :  { %v135_v30 = vadd.f32 %v163_v26, %v134_v29 }
 0x13f   :  { %144 = vst [vmem:[#allocation7 + $0x8] sm:$0xff] %v140_v28 }
 0x140   :  { %143 = vst [vmem:[#allocation7] sm:$0xff] %v135_v30 }
 0x141   :  { %309 = shalt.err (!%p306_p6)
}
 0x142   :  { %s310_s2 = scalar_lea.hbm %s402_s3, 256 }
 0x143   :  { %p311_p7 = scmp.ne.s32.totalorder %s402_s3, %s310_s2  ;;  %p314_p8 = scmp.lt.u32.totalorder %s310_s2, %s402_s3 }
 0x145   :  { %p316_p9 = pnand %p314_p8, %p311_p7 }
 0x147   :  { %319 = shalt.err (!%p316_p9)
}
 0x148   :  { %156 = dma.vmem_to_hbm [thread:$0]  %s151_s12, 256, %s402_s3, [#allocation4], %s327_s22, %s327_s22, %s328_s23  }
 0x149   :  { %324 = dma.done.wait [#allocation4], 256  }
 0x14a   :  { %325 = vsyncadd [#allocation4], 4294967040 }
 0x14b   :  { %160 = vsyncpa [#allocation3], 1 }
 0x14c   :  { %161 = vsyncpa [#allocation6], 1 }
 0x14d   :  { %162 = vsyncpa [#allocation4], 1 }

</bundles_post_ra>
